<compile_context>
chip_gen: v7x
topology: tpu7x:2x2x1
jax: 0.10.0
libtpu: 0.0.40
codegen_flags: <defaults>
</compile_context>

<pallas_src>
import functools

import jax
import jax.numpy as jnp
from jax import lax
from jax.experimental import pallas as pl
from jax.experimental.pallas import tpu as pltpu


_SLAB_BUDGET = 40 * 1024 * 1024   # bytes for in+out double-buffered slabs (v7x-safe)
_SEL_LIMIT = 256 * 1024           # max elements per (images, rows) selection matrix
_VMEM_CAP = 56 * 1024 * 1024      # stay under v7x's 64 MiB physical VMEM


def _chunk_width(hw):
    """Lane-chunk width for the deferred pooling reduction (multiple of 128)."""
    if hw >= 128:
        return min(512, (hw // 128) * 128)
    return 128  # dummy; everything is handled by the static tail slice


def _choose_fused_rows(B, C, HW, itemsize, cw):
    """Rows per fused block; None if even one image's slab cannot fit VMEM."""
    R = B * C
    per_row = HW * itemsize * 4 + cw * 8      # in+out double-buffered + pool scratch
    max_rows = _SLAB_BUDGET // per_row
    if max_rows < C:
        return None
    cands = [k * C for k in range(1, B + 1)
             if B % k == 0                    # whole images per block, R % br == 0
             and (k * C) % 8 == 0             # sublane-aligned block rows
             and k * C <= max_rows
             and k * k * C <= _SEL_LIMIT]     # keep selection matrices small
    if not cands:
        # Single full-extent row block (legal for any R) if it fits.
        if R <= max_rows and B * R <= _SEL_LIMIT:
            return R
        return None
    multi = [c for c in cands if R // c >= 2]  # >=2 blocks keeps both v7x cores busy
    return max(multi) if multi else max(cands)


# ----------------------------------------------------------------------------
# Fused kernel: pool + per-image MLPs + scale, one HBM read + one HBM write.
# ----------------------------------------------------------------------------
def _fused_kernel(L_ref, LT_ref, Rm_ref,
                  w1m_ref, b1m_ref, w2m_ref, b2m_ref,
                  w1a_ref, b1a_ref, w2a_ref, b2a_ref,
                  x_ref, o_ref, mx_acc, sm_acc,
                  *, hw, cw, n_full, inv_hw):
    f32 = jnp.float32

    # --- spatial max/sum pooling; cross-lane reduce deferred to block end ---
    mx_acc[...] = jnp.full(mx_acc.shape, -jnp.inf, f32)
    sm_acc[...] = jnp.zeros(sm_acc.shape, f32)

    def _accum(start):
        chunk = x_ref[:, pl.ds(start, cw)].astype(f32)
        mx_acc[...] = jnp.maximum(mx_acc[...], chunk)
        sm_acc[...] = sm_acc[...] + chunk

    if n_full <= 8:                       # small trip count: fully static slices
        for k in range(n_full):
            _accum(k * cw)
    else:
        def _body(k, carry):
            _accum(pl.multiple_of(k * cw, cw))
            return carry
        lax.fori_loop(0, n_full, _body, 0)

    mx_col = jnp.max(mx_acc[...], axis=-1, keepdims=True)     # (br, 1)
    sm_col = jnp.sum(sm_acc[...], axis=-1, keepdims=True)     # (br, 1)
    tail = hw - n_full * cw
    if tail > 0:                                              # static tail slice
        t = x_ref[:, n_full * cw:hw].astype(f32)
        mx_col = jnp.maximum(mx_col, jnp.max(t, axis=-1, keepdims=True))
        sm_col = sm_col + jnp.sum(t, axis=-1, keepdims=True)
    av_col = sm_col * inv_hw                                  # mean folded in here

    # --- per-image channel MLPs (tiny, once per block) -----------------------
    L, LT, Rm = L_ref[...], LT_ref[...], Rm_ref[...]
    # Regroup (br, 1) pooled columns into per-image (bk, C) matrices.
    m_max = jnp.dot(L, mx_col * Rm, preferred_element_type=f32)   # (bk, C)
    m_avg = jnp.dot(L, av_col * Rm, preferred_element_type=f32)   # (bk, C)

    def _mlp(v, w1, b1, w2, b2):
        h = jnp.maximum(jnp.dot(v, w1, preferred_element_type=f32) + b1, 0.0)
        return jax.nn.sigmoid(jnp.dot(h, w2, preferred_element_type=f32) + b2)

    w_max = _mlp(m_max, w1m_ref[...], b1m_ref[...], w2m_ref[...], b2m_ref[...])
    w_avg = _mlp(m_avg, w1a_ref[...], b1a_ref[...], w2a_ref[...], b2a_ref[...])
    wt = jax.nn.sigmoid(w_max + w_avg)                            # Mc, (bk, C)

    # Scatter (bk, C) weights back to one weight per row: (br, 1).
    w_col = jnp.sum(jnp.dot(LT, wt, preferred_element_type=f32) * Rm,
                    axis=-1, keepdims=True)

    # --- scale the VMEM-resident slab and write it out ------------------------
    def _scale(start):
        xs = x_ref[:, pl.ds(start, cw)].astype(f32)
        o_ref[:, pl.ds(start, cw)] = (w_col * xs).astype(o_ref.dtype)

    if n_full <= 8:
        for k in range(n_full):
            _scale(k * cw)
    else:
        def _wbody(k, carry):
            _scale(pl.multiple_of(k * cw, cw))
            return carry
        lax.fori_loop(0, n_full, _wbody, 0)
    if tail > 0:
        xt = x_ref[:, n_full * cw:hw].astype(f32)
        o_ref[:, n_full * cw:hw] = (w_col * xt).astype(o_ref.dtype)


def _fused_forward(x2, B, C, HW, br, cw, params):
    R = B * C
    dtype = x2.dtype
    itemsize = jnp.dtype(dtype).itemsize
    bk = br // C
    grid = (R // br,)
    n_full = HW // cw

    # Host-built, block-resident channel selection matrices (tiny).
    r_idx = jnp.arange(br)
    L = (r_idx[None, :] // C == jnp.arange(bk)[:, None]).astype(jnp.float32)  # (bk, br)
    LT = jnp.transpose(L)                                                     # (br, bk)
    Rm = (r_idx[:, None] % C == jnp.arange(C)[None, :]).astype(jnp.float32)   # (br, C)

    small = (L, LT, Rm,
             params["w1m"], params["b1m"], params["w2m"], params["b2m"],
             params["w1a"], params["b1a"], params["w2a"], params["b2a"])
    in_specs = [pl.BlockSpec(a.shape, lambda i: (0, 0)) for a in small]
    in_specs.append(pl.BlockSpec((br, HW), lambda i: (i, 0)))

    small_bytes = sum(int(a.size) * 4 for a in small)
    need = (4 * br * HW * itemsize       # x + out blocks, double-buffered
            + 2 * br * cw * 4            # pooling scratch accumulators
            + 2 * small_bytes)           # params / selection matrices
    vmem_limit = int(min(max(need + (4 << 20), 32 << 20), _VMEM_CAP))

    kernel = functools.partial(_fused_kernel, hw=HW, cw=cw, n_full=n_full,
                               inv_hw=1.0 / float(HW))
    return pl.pallas_call(
        kernel,
        out_shape=jax.ShapeDtypeStruct((R, HW), dtype),
        grid_spec=pltpu.PrefetchScalarGridSpec(
            num_scalar_prefetch=0,
            grid=grid,
            in_specs=in_specs,
            out_specs=pl.BlockSpec((br, HW), lambda i: (i, 0)),
            scratch_shapes=[pltpu.VMEM((br, cw), jnp.float32),
                            pltpu.VMEM((br, cw), jnp.float32)]),
        compiler_params=pltpu.CompilerParams(
            dimension_semantics=("parallel",),
            vmem_limit_bytes=vmem_limit),
        cost_estimate=pl.CostEstimate(
            flops=3 * R * HW,
            transcendentals=3 * R,
            bytes_accessed=2 * R * HW * itemsize + small_bytes),
    )(*small, x2)


# ----------------------------------------------------------------------------
# Fallback (slab too big for VMEM): tiled pool + plain-JAX MLPs + tiled scale.
# ----------------------------------------------------------------------------
def _pool_kernel(x_ref, max_ref, sum_ref, *, hw, bhw):
    j = pl.program_id(1)  # HW-tile index (reduction axis, last in grid)

    @pl.when(j == 0)
    def _():
        max_ref[...] = jnp.full(max_ref.shape, -jnp.inf, max_ref.dtype)
        sum_ref[...] = jnp.zeros(sum_ref.shape, sum_ref.dtype)

    tile = x_ref[...].astype(jnp.float32)
    if hw % bhw != 0:  # mask the padded tail of the last HW tile
        col = lax.broadcasted_iota(jnp.int32, tile.shape, 1) + j * bhw
        valid = col < hw
        tile_max = jnp.where(valid, tile, -jnp.inf)
        tile_sum = jnp.where(valid, tile, 0.0)
    else:
        tile_max = tile
        tile_sum = tile
    max_ref[...] = jnp.maximum(max_ref[...],
                               jnp.max(tile_max, axis=-1, keepdims=True))
    sum_ref[...] = sum_ref[...] + jnp.sum(tile_sum, axis=-1, keepdims=True)


def _scale_kernel(w_ref, x_ref, o_ref):
    o_ref[...] = (w_ref[...] * x_ref[...].astype(jnp.float32)).astype(o_ref.dtype)


def _split_forward(x2, B, C, HW, params):
    R = B * C
    dtype = x2.dtype
    itemsize = jnp.dtype(dtype).itemsize
    br = R if R < 8 else min(512, (R // 8) * 8)
    bhw = HW if HW < 128 else min(2048, (HW // 128) * 128)
    grid = (pl.cdiv(R, br), pl.cdiv(HW, bhw))
    vmem_limit = int(min(max(4 * br * bhw * itemsize + (8 << 20), 32 << 20),
                         _VMEM_CAP))

    pooled_max, pooled_sum = pl.pallas_call(
        functools.partial(_pool_kernel, hw=HW, bhw=bhw),
        out_shape=(jax.ShapeDtypeStruct((R, 1), jnp.float32),
                   jax.ShapeDtypeStruct((R, 1), jnp.float32)),
        grid_spec=pltpu.PrefetchScalarGridSpec(
            num_scalar_prefetch=0, grid=grid,
            in_specs=[pl.BlockSpec((br, bhw), lambda i, j: (i, j))],
            out_specs=[pl.BlockSpec((br, 1), lambda i, j: (i, 0)),
                       pl.BlockSpec((br, 1), lambda i, j: (i, 0))]),
        compiler_params=pltpu.CompilerParams(
            dimension_semantics=("parallel", "arbitrary"),
            vmem_limit_bytes=vmem_limit),
    )(x2)

    # Tiny MLPs in plain JAX: C, Cr are far below MXU tile size, a dedicated
    # pallas_call only adds dispatch overhead (per review).
    mx = pooled_max.reshape(B, C)
    av = (pooled_sum * (1.0 / float(HW))).reshape(B, C)

    def _mlp(v, w1, b1, w2, b2):
        h = jnp.maximum(v @ w1 + b1, 0.0)
        return jax.nn.sigmoid(h @ w2 + b2)

    weight = jax.nn.sigmoid(
        _mlp(mx, params["w1m"], params["b1m"], params["w2m"], params["b2m"])
        + _mlp(av, params["w1a"], params["b1a"], params["w2a"], params["b2a"]))
    w_rows = weight.reshape(R, 1)

    return pl.pallas_call(
        _scale_kernel,
        out_shape=jax.ShapeDtypeStruct((R, HW), dtype),
        grid_spec=pltpu.PrefetchScalarGridSpec(
            num_scalar_prefetch=0, grid=grid,
            in_specs=[pl.BlockSpec((br, 1), lambda i, j: (i, 0)),
                      pl.BlockSpec((br, bhw), lambda i, j: (i, j))],
            out_specs=pl.BlockSpec((br, bhw), lambda i, j: (i, j))),
        compiler_params=pltpu.CompilerParams(
            dimension_semantics=("parallel", "parallel"),
            vmem_limit_bytes=vmem_limit),
    )(w_rows, x2)


# ----------------------------------------------------------------------------
# Public entry point.
# ----------------------------------------------------------------------------
def channel_attention(x, params):
    """x: (B, C, H, W); params: pre-transposed (in, out) weights, (1, out) biases."""
    B, C, H, W = x.shape
    HW = H * W
    R = B * C
    x2 = x.reshape(R, HW)
    itemsize = jnp.dtype(x.dtype).itemsize
    cw = _chunk_width(HW)
    br = _choose_fused_rows(B, C, HW, itemsize, cw)
    if br is not None:
        out2 = _fused_forward(x2, B, C, HW, br, cw, params)
    else:
        out2 = _split_forward(x2, B, C, HW, params)
    return out2.reshape(B, C, H, W)


def _reference(x, p):
    """Pure-JAX reference mirroring the PyTorch forward."""
    B, C, H, W = x.shape
    hp = jax.lax.Precision.HIGHEST
    mx = jnp.max(x.reshape(B, C, -1), axis=-1)
    av = jnp.mean(x.reshape(B, C, -1), axis=-1)

    def mlp(v, w1, b1, w2, b2):
        h = jnp.maximum(jnp.dot(v, w1, precision=hp) + b1, 0.0)
        return jax.nn.sigmoid(jnp.dot(h, w2, precision=hp) + b2)

    max_w = mlp(mx, p["w1m"], p["b1m"], p["w2m"], p["b2m"])
    avg_w = mlp(av, p["w1a"], p["b1a"], p["w2a"], p["b2a"])
    weight = jax.nn.sigmoid(max_w + avg_w)
    return weight[:, :, None, None] * x


if __name__ == "__main__":
    key = jax.random.PRNGKey(0)
    B, C, H, W = 2, 4, 16, 16
    r = 0.5
    Cr = int(C * r)

    ks = jax.random.split(key, 9)
    x = jax.random.normal(ks[0], (B, C, H, W), jnp.float32)

    # Deterministic synthetic parameters. nn.Linear stores (out, in); here we
    # keep them pre-transposed to (in, out). Biases kept 2D (1, out) for TPU.
    params = dict(
        w1m=jax.random.normal(ks[1], (C, Cr), jnp.float32) * 0.5,
        b1m=jax.random.normal(ks[2], (1, Cr), jnp.float32) * 0.1,
        w2m=jax.random.normal(ks[3], (Cr, C), jnp.float32) * 0.5,
        b2m=jax.random.normal(ks[4], (1, C), jnp.float32) * 0.1,
        w1a=jax.random.normal(ks[5], (C, Cr), jnp.float32) * 0.5,
        b1a=jax.random.normal(ks[6], (1, Cr), jnp.float32) * 0.1,
        w2a=jax.random.normal(ks[7], (Cr, C), jnp.float32) * 0.5,
        b2a=jax.random.normal(ks[8], (1, C), jnp.float32) * 0.1,
    )

    out = channel_attention(x, params)
    jax.block_until_ready(out)

    ref = _reference(x, params)
    assert out.shape == (B, C, H, W)
    assert jnp.allclose(out, ref, atol=1e-5, rtol=1e-5), "mismatch vs reference"

    print("KERNEL_OK")
</pallas_src>

<mosaic_0001>
module attributes {stable_mosaic.version = 11 : i64} {
  func.func @_fused_kernel(%arg0: i32, %arg1: memref<2x8xf32, #tpu.memory_space<vmem>>, %arg2: memref<8x2xf32, #tpu.memory_space<vmem>>, %arg3: memref<8x4xf32, #tpu.memory_space<vmem>>, %arg4: memref<4x2xf32, #tpu.memory_space<vmem>>, %arg5: memref<1x2xf32, #tpu.memory_space<vmem>>, %arg6: memref<2x4xf32, #tpu.memory_space<vmem>>, %arg7: memref<1x4xf32, #tpu.memory_space<vmem>>, %arg8: memref<4x2xf32, #tpu.memory_space<vmem>>, %arg9: memref<1x2xf32, #tpu.memory_space<vmem>>, %arg10: memref<2x4xf32, #tpu.memory_space<vmem>>, %arg11: memref<1x4xf32, #tpu.memory_space<vmem>>, %arg12: memref<8x256xf32, #tpu.memory_space<vmem>>, %arg13: memref<8x256xf32, #tpu.memory_space<vmem>>, %arg14: memref<8x256xf32, #tpu.memory_space<vmem>>, %arg15: memref<8x256xf32, #tpu.memory_space<vmem>>) attributes {dimension_semantics = [#tpu.dimension_semantics<parallel>], iteration_bounds = array<i64: 1>, scalar_prefetch = 0 : i64, scratch_operands = 2 : i64, tpu.core_type = #tpu.core_type<tc>, window_params = [{pipeline_mode = #tpu.pipeline_mode<synchronous>, transform_indices = @transform_0, window_bounds = array<i64: 2, 8>}, {pipeline_mode = #tpu.pipeline_mode<synchronous>, transform_indices = @transform_1, window_bounds = array<i64: 8, 2>}, {pipeline_mode = #tpu.pipeline_mode<synchronous>, transform_indices = @transform_2, window_bounds = array<i64: 8, 4>}, {pipeline_mode = #tpu.pipeline_mode<synchronous>, transform_indices = @transform_3, window_bounds = array<i64: 4, 2>}, {pipeline_mode = #tpu.pipeline_mode<synchronous>, transform_indices = @transform_4, window_bounds = array<i64: 1, 2>}, {pipeline_mode = #tpu.pipeline_mode<synchronous>, transform_indices = @transform_5, window_bounds = array<i64: 2, 4>}, {pipeline_mode = #tpu.pipeline_mode<synchronous>, transform_indices = @transform_6, window_bounds = array<i64: 1, 4>}, {pipeline_mode = #tpu.pipeline_mode<synchronous>, transform_indices = @transform_7, window_bounds = array<i64: 4, 2>}, {pipeline_mode = #tpu.pipeline_mode<synchronous>, transform_indices = @transform_8, window_bounds = array<i64: 1, 2>}, {pipeline_mode = #tpu.pipeline_mode<synchronous>, transform_indices = @transform_9, window_bounds = array<i64: 2, 4>}, {pipeline_mode = #tpu.pipeline_mode<synchronous>, transform_indices = @transform_10, window_bounds = array<i64: 1, 4>}, {transform_indices = @transform_11, window_bounds = array<i64: 8, 256>}, {transform_indices = @transform_12, window_bounds = array<i64: 8, 256>}]} {
    %cst = arith.constant 0xFF800000 : f32
    %0 = vector.broadcast %cst : f32 to vector<8x256xf32>
    %c0 = arith.constant 0 : index
    %c0_0 = arith.constant 0 : index
    %1 = vector.load %arg14[%c0, %c0_0] : memref<8x256xf32, #tpu.memory_space<vmem>>, vector<8x256xf32>
    tpu.vector_store %arg14[%c0, %c0_0], %0 {strides = array<i32>} : memref<8x256xf32, #tpu.memory_space<vmem>>, vector<8x256xf32>,
    %cst_1 = arith.constant 0.000000e+00 : f32
    %2 = vector.broadcast %cst_1 : f32 to vector<8x256xf32>
    %c0_2 = arith.constant 0 : index
    %c0_3 = arith.constant 0 : index
    %3 = vector.load %arg15[%c0_2, %c0_3] : memref<8x256xf32, #tpu.memory_space<vmem>>, vector<8x256xf32>
    tpu.vector_store %arg15[%c0_2, %c0_3], %2 {strides = array<i32>} : memref<8x256xf32, #tpu.memory_space<vmem>>, vector<8x256xf32>,
    %c0_4 = arith.constant 0 : index
    %c0_5 = arith.constant 0 : index
    %4 = vector.load %arg12[%c0_4, %c0_5] : memref<8x256xf32, #tpu.memory_space<vmem>>, vector<8x256xf32>
    %c0_6 = arith.constant 0 : index
    %c0_7 = arith.constant 0 : index
    %5 = vector.load %arg14[%c0_6, %c0_7] : memref<8x256xf32, #tpu.memory_space<vmem>>, vector<8x256xf32>
    %6 = arith.maximumf %5, %4 : vector<8x256xf32>
    %c0_8 = arith.constant 0 : index
    %c0_9 = arith.constant 0 : index
    %7 = vector.load %arg14[%c0_8, %c0_9] : memref<8x256xf32, #tpu.memory_space<vmem>>, vector<8x256xf32>
    tpu.vector_store %arg14[%c0_8, %c0_9], %6 {strides = array<i32>} : memref<8x256xf32, #tpu.memory_space<vmem>>, vector<8x256xf32>,
    %c0_10 = arith.constant 0 : index
    %c0_11 = arith.constant 0 : index
    %8 = vector.load %arg15[%c0_10, %c0_11] : memref<8x256xf32, #tpu.memory_space<vmem>>, vector<8x256xf32>
    %9 = arith.addf %8, %4 : vector<8x256xf32>
    %c0_12 = arith.constant 0 : index
    %c0_13 = arith.constant 0 : index
    %10 = vector.load %arg15[%c0_12, %c0_13] : memref<8x256xf32, #tpu.memory_space<vmem>>, vector<8x256xf32>
    tpu.vector_store %arg15[%c0_12, %c0_13], %9 {strides = array<i32>} : memref<8x256xf32, #tpu.memory_space<vmem>>, vector<8x256xf32>,
    %c0_14 = arith.constant 0 : index
    %c0_15 = arith.constant 0 : index
    %11 = vector.load %arg14[%c0_14, %c0_15] : memref<8x256xf32, #tpu.memory_space<vmem>>, vector<8x256xf32>
    %cst_16 = arith.constant dense<0xFF800000> : vector<8xf32>
    %12 = vector.multi_reduction <maximumf>, %11, %cst_16 [1] : vector<8x256xf32> to vector<8xf32>
    %13 = vector.shape_cast %12 : vector<8xf32> to vector<8x1xf32>
    %c0_17 = arith.constant 0 : index
    %c0_18 = arith.constant 0 : index
    %14 = vector.load %arg15[%c0_17, %c0_18] : memref<8x256xf32, #tpu.memory_space<vmem>>, vector<8x256xf32>
    %cst_19 = arith.constant dense<0.000000e+00> : vector<8xf32>
    %15 = vector.multi_reduction <add>, %14, %cst_19 [1] : vector<8x256xf32> to vector<8xf32>
    %16 = vector.shape_cast %15 : vector<8xf32> to vector<8x1xf32>
    %cst_20 = arith.constant 3.906250e-03 : f32
    %17 = vector.broadcast %cst_20 : f32 to vector<8x1xf32>
    %18 = arith.mulf %16, %17 : vector<8x1xf32>
    %c0_21 = arith.constant 0 : index
    %c0_22 = arith.constant 0 : index
    %19 = vector.load %arg1[%c0_21, %c0_22] : memref<2x8xf32, #tpu.memory_space<vmem>>, vector<2x8xf32>
    %c0_23 = arith.constant 0 : index
    %c0_24 = arith.constant 0 : index
    %20 = vector.load %arg2[%c0_23, %c0_24] : memref<8x2xf32, #tpu.memory_space<vmem>>, vector<8x2xf32>
    %c0_25 = arith.constant 0 : index
    %c0_26 = arith.constant 0 : index
    %21 = vector.load %arg3[%c0_25, %c0_26] : memref<8x4xf32, #tpu.memory_space<vmem>>, vector<8x4xf32>
    %22 = vector.broadcast %13 : vector<8x1xf32> to vector<8x4xf32>
    %23 = arith.mulf %22, %21 : vector<8x4xf32>
    %cst_27 = arith.constant dense<0.000000e+00> : vector<2x4xf32>
    %24 = tpu.matmul %19, %23, %cst_27 {dimension_numbers = #tpu.dot_dimension_numbers<[1], [0], [0], [1], [0, 0, 1, 1], [], []>} : vector<2x8xf32>, vector<8x4xf32>, vector<2x4xf32> -> vector<2x4xf32>
    %25 = vector.broadcast %18 : vector<8x1xf32> to vector<8x4xf32>
    %26 = arith.mulf %25, %21 : vector<8x4xf32>
    %cst_28 = arith.constant dense<0.000000e+00> : vector<2x4xf32>
    %27 = tpu.matmul %19, %26, %cst_28 {dimension_numbers = #tpu.dot_dimension_numbers<[1], [0], [0], [1], [0, 0, 1, 1], [], []>} : vector<2x8xf32>, vector<8x4xf32>, vector<2x4xf32> -> vector<2x4xf32>
    %c0_29 = arith.constant 0 : index
    %c0_30 = arith.constant 0 : index
    %28 = vector.load %arg4[%c0_29, %c0_30] : memref<4x2xf32, #tpu.memory_space<vmem>>, vector<4x2xf32>
    %c0_31 = arith.constant 0 : index
    %c0_32 = arith.constant 0 : index
    %29 = vector.load %arg5[%c0_31, %c0_32] : memref<1x2xf32, #tpu.memory_space<vmem>>, vector<1x2xf32>
    %c0_33 = arith.constant 0 : index
    %c0_34 = arith.constant 0 : index
    %30 = vector.load %arg6[%c0_33, %c0_34] : memref<2x4xf32, #tpu.memory_space<vmem>>, vector<2x4xf32>
    %c0_35 = arith.constant 0 : index
    %c0_36 = arith.constant 0 : index
    %31 = vector.load %arg7[%c0_35, %c0_36] : memref<1x4xf32, #tpu.memory_space<vmem>>, vector<1x4xf32>
    %cst_37 = arith.constant dense<0.000000e+00> : vector<2x2xf32>
    %32 = tpu.matmul %24, %28, %cst_37 {dimension_numbers = #tpu.dot_dimension_numbers<[1], [0], [0], [1], [0, 0, 1, 1], [], []>} : vector<2x4xf32>, vector<4x2xf32>, vector<2x2xf32> -> vector<2x2xf32>
    %33 = vector.broadcast %29 : vector<1x2xf32> to vector<2x2xf32>
    %34 = arith.addf %32, %33 : vector<2x2xf32>
    %cst_38 = arith.constant 0.000000e+00 : f32
    %35 = vector.broadcast %cst_38 : f32 to vector<2x2xf32>
    %36 = arith.maximumf %34, %35 : vector<2x2xf32>
    %cst_39 = arith.constant dense<0.000000e+00> : vector<2x4xf32>
    %37 = tpu.matmul %36, %30, %cst_39 {dimension_numbers = #tpu.dot_dimension_numbers<[1], [0], [0], [1], [0, 0, 1, 1], [], []>} : vector<2x2xf32>, vector<2x4xf32>, vector<2x4xf32> -> vector<2x4xf32>
    %38 = vector.broadcast %31 : vector<1x4xf32> to vector<2x4xf32>
    %39 = arith.addf %37, %38 : vector<2x4xf32>
    %40 = arith.negf %39 : vector<2x4xf32>
    %41 = math.exp %40 : vector<2x4xf32>
    %cst_40 = arith.constant 1.000000e+00 : f32
    %42 = vector.broadcast %cst_40 : f32 to vector<2x4xf32>
    %43 = arith.addf %42, %41 : vector<2x4xf32>
    %44 = arith.divf %42, %43 : vector<2x4xf32>
    %c0_41 = arith.constant 0 : index
    %c0_42 = arith.constant 0 : index
    %45 = vector.load %arg8[%c0_41, %c0_42] : memref<4x2xf32, #tpu.memory_space<vmem>>, vector<4x2xf32>
    %c0_43 = arith.constant 0 : index
    %c0_44 = arith.constant 0 : index
    %46 = vector.load %arg9[%c0_43, %c0_44] : memref<1x2xf32, #tpu.memory_space<vmem>>, vector<1x2xf32>
    %c0_45 = arith.constant 0 : index
    %c0_46 = arith.constant 0 : index
    %47 = vector.load %arg10[%c0_45, %c0_46] : memref<2x4xf32, #tpu.memory_space<vmem>>, vector<2x4xf32>
    %c0_47 = arith.constant 0 : index
    %c0_48 = arith.constant 0 : index
    %48 = vector.load %arg11[%c0_47, %c0_48] : memref<1x4xf32, #tpu.memory_space<vmem>>, vector<1x4xf32>
    %cst_49 = arith.constant dense<0.000000e+00> : vector<2x2xf32>
    %49 = tpu.matmul %27, %45, %cst_49 {dimension_numbers = #tpu.dot_dimension_numbers<[1], [0], [0], [1], [0, 0, 1, 1], [], []>} : vector<2x4xf32>, vector<4x2xf32>, vector<2x2xf32> -> vector<2x2xf32>
    %50 = vector.broadcast %46 : vector<1x2xf32> to vector<2x2xf32>
    %51 = arith.addf %49, %50 : vector<2x2xf32>
    %cst_50 = arith.constant 0.000000e+00 : f32
    %52 = vector.broadcast %cst_50 : f32 to vector<2x2xf32>
    %53 = arith.maximumf %51, %52 : vector<2x2xf32>
    %cst_51 = arith.constant dense<0.000000e+00> : vector<2x4xf32>
    %54 = tpu.matmul %53, %47, %cst_51 {dimension_numbers = #tpu.dot_dimension_numbers<[1], [0], [0], [1], [0, 0, 1, 1], [], []>} : vector<2x2xf32>, vector<2x4xf32>, vector<2x4xf32> -> vector<2x4xf32>
    %55 = vector.broadcast %48 : vector<1x4xf32> to vector<2x4xf32>
    %56 = arith.addf %54, %55 : vector<2x4xf32>
    %57 = arith.negf %56 : vector<2x4xf32>
    %58 = math.exp %57 : vector<2x4xf32>
    %cst_52 = arith.constant 1.000000e+00 : f32
    %59 = vector.broadcast %cst_52 : f32 to vector<2x4xf32>
    %60 = arith.addf %59, %58 : vector<2x4xf32>
    %61 = arith.divf %59, %60 : vector<2x4xf32>
    %62 = arith.addf %44, %61 : vector<2x4xf32>
    %63 = arith.negf %62 : vector<2x4xf32>
    %64 = math.exp %63 : vector<2x4xf32>
    %cst_53 = arith.constant 1.000000e+00 : f32
    %65 = vector.broadcast %cst_53 : f32 to vector<2x4xf32>
    %66 = arith.addf %65, %64 : vector<2x4xf32>
    %67 = arith.divf %65, %66 : vector<2x4xf32>
    %cst_54 = arith.constant dense<0.000000e+00> : vector<8x4xf32>
    %68 = tpu.matmul %20, %67, %cst_54 {dimension_numbers = #tpu.dot_dimension_numbers<[1], [0], [0], [1], [0, 0, 1, 1], [], []>} : vector<8x2xf32>, vector<2x4xf32>, vector<8x4xf32> -> vector<8x4xf32>
    %69 = arith.mulf %68, %21 : vector<8x4xf32>
    %cst_55 = arith.constant dense<0.000000e+00> : vector<8xf32>
    %70 = vector.multi_reduction <add>, %69, %cst_55 [1] : vector<8x4xf32> to vector<8xf32>
    %71 = vector.shape_cast %70 : vector<8xf32> to vector<8x1xf32>
    %c0_56 = arith.constant 0 : index
    %c0_57 = arith.constant 0 : index
    %72 = vector.load %arg12[%c0_56, %c0_57] : memref<8x256xf32, #tpu.memory_space<vmem>>, vector<8x256xf32>
    %73 = vector.broadcast %71 : vector<8x1xf32> to vector<8x256xf32>
    %74 = arith.mulf %73, %72 : vector<8x256xf32>
    %c0_58 = arith.constant 0 : index
    %c0_59 = arith.constant 0 : index
    %75 = vector.load %arg13[%c0_58, %c0_59] : memref<8x256xf32, #tpu.memory_space<vmem>>, vector<8x256xf32>
    tpu.vector_store %arg13[%c0_58, %c0_59], %74 {strides = array<i32>} : memref<8x256xf32, #tpu.memory_space<vmem>>, vector<8x256xf32>,
    return
  }
  func.func @transform_0(%arg0: i32) -> (i32, i32) {
    %c0_i32 = arith.constant 0 : i32
    %c0_i32_0 = arith.constant 0 : i32
    %c0_i32_1 = arith.constant 0 : i32
    return %c0_i32, %c0_i32_0 : i32, i32
  }
  func.func @transform_1(%arg0: i32) -> (i32, i32) {
    %c0_i32 = arith.constant 0 : i32
    %c0_i32_0 = arith.constant 0 : i32
    %c0_i32_1 = arith.constant 0 : i32
    return %c0_i32, %c0_i32_0 : i32, i32
  }
  func.func @transform_2(%arg0: i32) -> (i32, i32) {
    %c0_i32 = arith.constant 0 : i32
    %c0_i32_0 = arith.constant 0 : i32
    %c0_i32_1 = arith.constant 0 : i32
    return %c0_i32, %c0_i32_0 : i32, i32
  }
  func.func @transform_3(%arg0: i32) -> (i32, i32) {
    %c0_i32 = arith.constant 0 : i32
    %c0_i32_0 = arith.constant 0 : i32
    %c0_i32_1 = arith.constant 0 : i32
    return %c0_i32, %c0_i32_0 : i32, i32
  }
  func.func @transform_4(%arg0: i32) -> (i32, i32) {
    %c0_i32 = arith.constant 0 : i32
    %c0_i32_0 = arith.constant 0 : i32
    %c0_i32_1 = arith.constant 0 : i32
    return %c0_i32, %c0_i32_0 : i32, i32
  }
  func.func @transform_5(%arg0: i32) -> (i32, i32) {
    %c0_i32 = arith.constant 0 : i32
    %c0_i32_0 = arith.constant 0 : i32
    %c0_i32_1 = arith.constant 0 : i32
    return %c0_i32, %c0_i32_0 : i32, i32
  }
  func.func @transform_6(%arg0: i32) -> (i32, i32) {
    %c0_i32 = arith.constant 0 : i32
    %c0_i32_0 = arith.constant 0 : i32
    %c0_i32_1 = arith.constant 0 : i32
    return %c0_i32, %c0_i32_0 : i32, i32
  }
  func.func @transform_7(%arg0: i32) -> (i32, i32) {
    %c0_i32 = arith.constant 0 : i32
    %c0_i32_0 = arith.constant 0 : i32
    %c0_i32_1 = arith.constant 0 : i32
    return %c0_i32, %c0_i32_0 : i32, i32
  }
  func.func @transform_8(%arg0: i32) -> (i32, i32) {
    %c0_i32 = arith.constant 0 : i32
    %c0_i32_0 = arith.constant 0 : i32
    %c0_i32_1 = arith.constant 0 : i32
    return %c0_i32, %c0_i32_0 : i32, i32
  }
  func.func @transform_9(%arg0: i32) -> (i32, i32) {
    %c0_i32 = arith.constant 0 : i32
    %c0_i32_0 = arith.constant 0 : i32
    %c0_i32_1 = arith.constant 0 : i32
    return %c0_i32, %c0_i32_0 : i32, i32
  }
  func.func @transform_10(%arg0: i32) -> (i32, i32) {
    %c0_i32 = arith.constant 0 : i32
    %c0_i32_0 = arith.constant 0 : i32
    %c0_i32_1 = arith.constant 0 : i32
    return %c0_i32, %c0_i32_0 : i32, i32
  }
  func.func @transform_11(%arg0: i32) -> (i32, i32) {
    %c0_i32 = arith.constant 0 : i32
    %c0_i32_0 = arith.constant 0 : i32
    return %arg0, %c0_i32 : i32, i32
  }
  func.func @transform_12(%arg0: i32) -> (i32, i32) {
    %c0_i32 = arith.constant 0 : i32
    %c0_i32_0 = arith.constant 0 : i32
    return %arg0, %c0_i32 : i32, i32
  }
}

</mosaic_0001>

<bundles_post_ra>
// kernel: tpu_custom_call.1
= control target key start
LH: loop header
LB: loop body
LE: loop exit
PB: predicated region body
PF: predicated region fallthrough
CT: control target
= control target key end

     0   :  { %s938_s0 = inlined_call_operand.vmem [shape: f32[2,8], index: 0, kind: input, shape index: {}]   ;;  %s939_s1 = inlined_call_operand.vmem [shape: f32[8,2], index: 1, kind: input, shape index: {}]   ;;  %s940_s2 = inlined_call_operand.vmem [shape: f32[8,4], index: 2, kind: input, shape index: {}]   ;;  %s941_s3 = inlined_call_operand.vmem [shape: f32[4,2], index: 3, kind: input, shape index: {}]   ;;  %s942_s4 = inlined_call_operand.vmem [shape: f32[1,2], index: 4, kind: input, shape index: {}]   ;;  %s943_s5 = inlined_call_operand.vmem [shape: f32[2,4], index: 5, kind: input, shape index: {}]   ;;  %s944_s6 = inlined_call_operand.vmem [shape: f32[1,4], index: 6, kind: input, shape index: {}]   ;;  %s945_s7 = inlined_call_operand.vmem [shape: f32[4,2], index: 7, kind: input, shape index: {}]   ;;  %s946_s8 = inlined_call_operand.vmem [shape: f32[1,2], index: 8, kind: input, shape index: {}]   ;;  %s947_s9 = inlined_call_operand.vmem [shape: f32[2,4], index: 9, kind: input, shape index: {}]   ;;  %s948_s10 = inlined_call_operand.vmem [shape: f32[1,4], index: 10, kind: input, shape index: {}]   ;;  %s949_s11 = inlined_call_operand.vmem [shape: f32[8,256], index: 11, kind: input, shape index: {}]   ;;  %s950_s12 = inlined_call_operand.hbm [shape: f32[8,256], index: 12, kind: output, shape index: {}]  }
   0x1   :  { %v859_v0 = vld [vmem:[%s949_s11] sm:$0xff]  ;;  %v864_v1 = vld [vmem:[%s949_s11 + $0x8] sm:$0xff] }
   0x2   :  { %v62_v2 = vmax.f32 %v859_v0, %v864_v1 }
   0x3   :  { %17 = vsyncpa [#allocation5], 0  ;;  %v67_v3 = vadd.f32 %v864_v1, %v859_v0  ;;  %v788_v4 = vmov 0.0   ;;  %vm789_vm0 = vmmov 0   ;;  %v875_v5 = vld [vmem:[%s940_s2] sm:$0xff]  ;;  %vm75_vm1 = vcmask 64512  }
   0x4   :  { %63 = vmax.xlane.f32.xlu0 %v62_v2  ;;  %714 = vmatprep.subr.mxu0 %v788_v4  ;;  %v71_v8 = vld [vmem:[%s938_s0] sm:$0x3]  ;;  %vm234_vm2 = vcmask 1043456   ;;  %vm230_vm3 = vcmask 31744   ;;  %vm319_vm4 = vcmask 1041408   ;;  %vm315_vm5 = vcmask 15360  }
   0x5   :  { %719 = vmatprep.subr.mxu1 %v788_v4  ;;  %716 = vmatprep.mubr.msk.f32.mxu0 %vm789_vm0, %v788_v4  ;;  %v220_v12 = vld [vmem:[%s941_s3] sm:$0xf]  ;;  %s790_s18 = smov [#allocation4]  }
   0x6   :  { %721 = vmatprep.mubr.msk.f32.mxu1 %vm789_vm0, %v788_v4  ;;  %v399_v13 = vld [vmem:[%s945_s7] sm:$0xf]  ;;  %s673_s19 = sshll.u32 %s790_s18, 4  ;;  %s674_s19 = int_to_ptr.vmem [resolvable:$true] %s673_s19 }
   0x7   :  { %v222_v18 = vld [vmem:[%s943_s5] sm:$0x3]  ;;  %p769_p1 = scmp.lt.s32.totalorder %s674_s19, %s674_s19 }
   0x8   :  { %68 = vadd.xlane.f32.xlu0 %v67_v3  ;;  %v683_v19 = vld [vmem:[%s942_s4] ss:$0 sm:$0xff] }
   0x9   :  { %v401_v24 = vld [vmem:[%s947_s9] sm:$0x3] }
   0xa   :  { %v690_v25 = vld [vmem:[%s946_s8] ss:$0 sm:$0xff] }
   0xb   :  { %v686_v30 = vld [vmem:[%s944_s6] ss:$0 sm:$0xff] }
   0xc   :  { %v693_v35 = vld [vmem:[%s948_s10] ss:$0 sm:$0xff] }
   0xd   :  { %v72_v50 = vld [vmem:[%s939_s1] sm:$0xff]  ;;  %s764_s1 = scalar_lea.vmem %s674_s19, 256 }
   0xe   :  { %p765_p0 = scmp.ne.s32.totalorder %s674_s19, %s764_s1  ;;  %p770_p2 = scmp.lt.s32.totalorder %s764_s1, %s764_s1 }
  0x10   :  { %p771_p3 = por %p770_p2, %p769_p1 }
  0x12   :  { %p772_p4 = pnand %p771_p3, %p765_p0 }
  0x91   :  { %v64_v6 = vpop.xlane.xlu0 %63 }
  0x92   :  { %v74_v7 = vmul.f32 %v875_v5, %v64_v6 }
  0x94   :  { %715 = vmatpush3.msra.mxu0 %v74_v7 }
  0x95   :  { %v69_v9 = vpop.xlane.xlu0 %68  ;;  %717 = vmatmul.mubr.msk.f32.vlgmr.msra.gmra.mrb[0].mxu0 %vm75_vm1, %v71_v8  ;;  %724 = vmatprep.subr.mxu0 %v788_v4 }
  0x96   :  { %v70_v10 = vmul.f32 0.00390625, %v69_v9  ;;  %726 = vmatprep.mubr.msk.f32.mxu0 %vm789_vm0, %v788_v4  ;;  %725 = vmatpush3.msk.msra.mxu0 %vm234_vm2, %v220_v12 }
  0x97   :  { %734 = vmatprep.subr.mxu0 %v788_v4 }
  0x98   :  { %v149_v11 = vmul.f32 %v875_v5, %v70_v10 }
  0x9a   :  { %720 = vmatpush3.msra.mxu1 %v149_v11 }
  0x9b   :  { %722 = vmatmul.mubr.msk.f32.vlgmr.msra.gmra.mrb[0].mxu1 %vm75_vm1, %v71_v8  ;;  %729 = vmatprep.subr.mxu1 %v788_v4 }
  0x9c   :  { %731 = vmatprep.mubr.msk.f32.mxu1 %vm789_vm0, %v788_v4  ;;  %730 = vmatpush3.msk.msra.mxu1 %vm319_vm4, %v222_v18 }
  0x9d   :  { %739 = vmatprep.subr.mxu1 %v788_v4 }
 0x168   :  { %v145_v14 = vpop.f32.mrb[0].mxu0 }
 0x169   :  { %v718_v15 = vpop.f32.mrb[1].mxu0  ;;  %727 = vmatmul.mubr.msk.f32.vlgmr.msra.gmra.mrb[2].mxu0 %vm230_vm3, %v145_v14 }
 0x16a   :  { %735 = vmatpush3.msk.msra.mxu0 %vm234_vm2, %v399_v13  ;;  %736 = vmatprep.mubr.msk.f32.mxu0 %vm789_vm0, %v788_v4 }
 0x16b   :  { %744 = vmatprep.subr.mxu0 %v788_v4 }
 0x16e   :  { %v216_v16 = vpop.f32.mrb[0].mxu1 }
 0x16f   :  { %v723_v17 = vpop.f32.mrb[1].mxu1  ;;  %737 = vmatmul.mubr.msk.f32.vlgmr.msra.gmra.mrb[4].mxu0 %vm230_vm3, %v216_v16 }
 0x170   :  { %746 = vmatprep.mubr.msk.f32.mxu0 %vm789_vm0, %v788_v4 }
 0x23c   :  { %v304_v20 = vpop.f32.mrb[2].mxu0 }
 0x23d   :  { %v305_v21 = vadd.f32 %v683_v19, %v304_v20  ;;  %v728_v22 = vpop.f32.mrb[3].mxu0 }
 0x23f   :  { %v308_v23 = vmax.f32 %v305_v21, 0.0 }
 0x241   :  { %732 = vmatmul.mubr.msk.f32.vlgmr.msra.gmra.mrb[2].mxu1 %vm315_vm5, %v308_v23 }
 0x242   :  { %v481_v26 = vpop.f32.mrb[4].mxu0  ;;  %740 = vmatpush3.msk.msra.mxu1 %vm319_vm4, %v401_v24  ;;  %741 = vmatprep.mubr.msk.f32.mxu1 %vm789_vm0, %v788_v4 }
 0x243   :  { %v482_v27 = vadd.f32 %v690_v25, %v481_v26  ;;  %v738_v28 = vpop.f32.mrb[5].mxu0 }
 0x245   :  { %v485_v29 = vmax.f32 %v482_v27, 0.0 }
 0x247   :  { %742 = vmatmul.mubr.msk.f32.vlgmr.msra.gmra.mrb[4].mxu1 %vm315_vm5, %v485_v29 }
 0x314   :  { %v389_v31 = vpop.f32.mrb[2].mxu1 }
 0x315   :  { %v390_v32 = vadd.f32 %v686_v30, %v389_v31  ;;  %v733_v33 = vpop.f32.mrb[3].mxu1 }
 0x317   :  { %v689_v34 = vmul.f32 -1.442695, %v390_v32 }
 0x319   :  { %752 = vpow2.f32 %v689_v34 }
 0x31a   :  { %v564_v36 = vpop.f32.mrb[4].mxu1 }
 0x31b   :  { %v565_v37 = vadd.f32 %v693_v35, %v564_v36  ;;  %v743_v38 = vpop.f32.mrb[5].mxu1 }
 0x31d   :  { %v696_v39 = vmul.f32 -1.442695, %v565_v37 }
 0x31f   :  { %754 = vpow2.f32 %v696_v39 }
 0x323   :  { %v753_v40 = vpop.eup %752 }
 0x324   :  { %v396_v41 = vadd.f32 1.0, %v753_v40 }
 0x326   :  { %756 = vrcp.f32 %v396_v41 }
 0x329   :  { %v755_v42 = vpop.eup %754 }
 0x32a   :  { %v571_v43 = vadd.f32 1.0, %v755_v42 }
 0x32c   :  { %758 = vrcp.f32 %v571_v43 }
 0x330   :  { %v757_v44 = vpop.eup %756 }
 0x336   :  { %v759_v45 = vpop.eup %758 }
 0x337   :  { %v574_v46 = vadd.f32 %v759_v45, %v757_v44 }
 0x339   :  { %v697_v47 = vmul.f32 -1.442695, %v574_v46 }
 0x33b   :  { %760 = vpow2.f32 %v697_v47 }
 0x345   :  { %v761_v48 = vpop.eup %760 }
 0x346   :  { %v578_v49 = vadd.f32 1.0, %v761_v48 }
 0x348   :  { %762 = vrcp.f32 %v578_v49 }
 0x352   :  { %v763_v51 = vpop.eup %762 }
 0x353   :  { %745 = vmatpush3.msk.msra.mxu0 %vm319_vm4, %v763_v51 }
 0x354   :  { %747 = vmatmul.mubr.msk.f32.vlgmr.msra.gmra.mrb[6].mxu0 %vm315_vm5, %v72_v50 }
 0x427   :  { %v653_v52 = vpop.f32.mrb[6].mxu0 }
 0x428   :  { %v657_v53 = vmul.f32 %v653_v52, %v875_v5  ;;  %v748_v54 = vpop.f32.mrb[7].mxu0 }
 0x42a   :  { %v658_v55 = vsel %vm230_vm3, %v657_v53, 0.0 }
 0x42b   :  { %659 = vadd.xlane.f32.xlu1 %v658_v55 }
 0x4b8   :  { %v660_v56 = vpop.xlane.xlu1 %659 }
 0x4b9   :  { %v663_v57 = vmul.f32 %v660_v56, %v859_v0  ;;  %v664_v58 = vmul.f32 %v660_v56, %v864_v1 }
 0x4bb   :  { %665 = vst [vmem:[#allocation4] sm:$0xff] %v663_v57  ;;  %666 = vst [vmem:[#allocation4 + $0x8] sm:$0xff] %v664_v58 }
 0x4bc   :  { %775 = shalt.err (!%p772_p4)
}
 0x4bd   :  { %s776_s22 = scalar_lea.hbm %s950_s12, 256 }
 0x4be   :  { %p777_p5 = scmp.ne.s32.totalorder %s950_s12, %s776_s22  ;;  %p780_p6 = scmp.lt.u32.totalorder %s776_s22, %s950_s12 }
 0x4c0   :  { %p782_p7 = pnand %p780_p6, %p777_p5 }
 0x4c2   :  { %785 = shalt.err (!%p782_p7)
}
 0x4c3   :  { %676 = dma.vmem_to_hbm [thread:$0]  %s674_s19, 256, %s950_s12, [#allocation5]  }
 0x4c4   :  { %786 = dma.done.wait [#allocation5], 256  }
 0x4c5   :  { %787 = vsyncadd [#allocation5], 4294967040 }
 0x4c6   :  { %680 = vsyncpa [#allocation5], 1 }

</bundles_post_ra>
